<compile_context>
chip_gen: v7x
topology: tpu7x:2x2x1
jax: 0.10.0
libtpu: 0.0.40
codegen_flags: <defaults>
</compile_context>

<pallas_src>
import functools
import numpy as np
import jax
import jax.numpy as jnp
from jax.experimental import pallas as pl
from jax.experimental.pallas import tpu as pltpu


def build_join_convolve_tensor(signal_dim, kernel_dim, kernel_loc):
    """Exact port of the PyTorch buffer builder."""
    M = np.zeros((signal_dim, signal_dim, kernel_dim), dtype=np.float32)
    for i in range(signal_dim):
        for j in range(i, signal_dim):
            for k in range(kernel_dim):
                if i == max(j, k + kernel_loc):
                    M[i, j, k] = 1.0
    return jnp.asarray(M)


def _round_up(x, m):
    return (x + m - 1) // m * m


def _cdiv(a, b):
    return -(-a // b)


def _maybe_pad(x, pads):
    if any(p[0] or p[1] for p in pads):
        return jnp.pad(x, pads)
    return x


def _usable_vmem_bytes():
    # 0.75x physical VMEM as the usable ceiling (headroom for compiler scratch /
    # double-buffers).  Fallback is the v7x-safe 64 MiB physical size.
    try:
        cap = int(pltpu.get_tpu_info().vmem_capacity_bytes)
    except Exception:
        cap = 64 * 1024 * 1024
    return int(0.75 * cap)


def _joinconv_gemm_kernel(w_ref, x_ref, b_ref, o_ref, acc_ref):
    # grid = (nn, nk)
    #   axis 0 "parallel":  lane tiles of the fused (m, x, y) dimension
    #   axis 1 "arbitrary": reduction over the folded (f, a, b) contraction
    k = pl.program_id(1)
    nk = pl.num_programs(1)

    @pl.when(k == 0)
    def _():
        # f32 accumulator scratch initialized with the broadcast bias.
        acc_ref[...] = jnp.broadcast_to(b_ref[...], acc_ref.shape)

    acc_ref[...] += jnp.dot(w_ref[...], x_ref[...],
                            preferred_element_type=jnp.float32)

    @pl.when(k == nk - 1)
    def _():
        o_ref[...] = acc_ref[...].astype(o_ref.dtype)


def join_conv2d_forward(X, conv_x, conv_y, weights, bias, *,
                        tn=2048, tk=512, compute_dtype=jnp.bfloat16):
    """Forward pass of JoinConv2d.  Returns Y of shape (M, G, Sx, Sy)."""
    M, F, Sx, Sy = X.shape
    Kx, Ky, F2, G = weights.shape
    assert F2 == F

    cdt = jnp.dtype(compute_dtype)
    itemsize = cdt.itemsize

    # ---- separable staging (avoids the dense Sx^2*Sy^2*F*G folded operator) ----
    # The conv_x/conv_y contractions are pure selections (each output element has
    # at most one nonzero term), so running them in bf16 is exact on bf16 inputs.
    # TODO(synk): fuse the two staging einsums into the Pallas pipeline if profiles
    # show them dominating at scale.
    prec = jax.lax.Precision.HIGHEST if cdt == jnp.dtype(jnp.float32) else None
    Xc = X.astype(cdt)
    t1 = jnp.einsum('mfij,ixa->mfjxa', Xc, conv_x.astype(cdt), precision=prec)
    xcolT = jnp.einsum('mfjxa,jyb->fabmxy', t1, conv_y.astype(cdt),
                       precision=prec)
    Kdim = F * Kx * Ky
    Ndim = M * Sx * Sy
    xcolT = xcolT.reshape(Kdim, Ndim)                       # rows (f,a,b), cols (m,x,y)
    wT = jnp.transpose(weights, (3, 2, 0, 1)).reshape(G, Kdim).astype(cdt)
    bias2d = bias.reshape(G, 1).astype(jnp.float32)

    vmem_cap = _usable_vmem_bytes()

    # ---- N tiling (lane axis of the GEMM; "parallel" grid dim) ----
    Gpad = _round_up(G, 16)
    Npad = _round_up(Ndim, 128)
    tn_eff = min(_round_up(tn, 128), Npad)
    if tn_eff == Npad and Npad >= 256:
        # keep >= 2 N tiles so the "parallel" axis can shard across v7x's 2 TCs
        tn_eff = _round_up(_cdiv(Npad, 2), 128)
    nn = _cdiv(Npad, tn_eff)
    Npad = nn * tn_eff

    # ---- K tiling (contraction; "arbitrary" grid dim, last) ----
    sub = 16 if itemsize < 4 else 8
    Kpad_full = _round_up(Kdim, sub)
    full_k_bytes = 2 * (Gpad * Kpad_full + Kpad_full * tn_eff) * itemsize
    if full_k_bytes <= vmem_cap // 2:
        # Single reduction block: K padded only to the sublane multiple.  The
        # block spans the full K dim, so the (8,128) rule's full-dim exemption
        # covers both W^T's lane axis and Xcol^T's sublane axis.
        Kpad, tk_eff, nk = Kpad_full, Kpad_full, 1
    else:
        # Tiled reduction: blocks no longer span full K -> 128-aligned tiles,
        # balanced so K zero-padding never exceeds one extra 128-chunk per tile.
        chunks = _cdiv(Kdim, 128)
        per_tile = max(1, min(max(tk, 128) // 128, chunks))
        nk = _cdiv(chunks, per_tile)
        per_tile = _cdiv(chunks, nk)
        tk_eff = per_tile * 128
        Kpad = nk * tk_eff

    # Zero padding is exact for the sum; skipped entirely when already aligned.
    xcolT_p = _maybe_pad(xcolT, ((0, Kpad - Kdim), (0, Npad - Ndim)))
    wT_p = _maybe_pad(wT, ((0, Gpad - G), (0, Kpad - Kdim)))
    bias_p = _maybe_pad(bias2d, ((0, Gpad - G), (0, 0)))

    # ---- VMEM budget: double-buffered inputs/outputs + f32 accumulator ----
    est = (2 * (Gpad * tk_eff + tk_eff * tn_eff) * itemsize   # W^T, Xcol^T
           + 2 * Gpad * 4                                      # bias (f32)
           + 2 * Gpad * tn_eff * itemsize                      # output block
           + Gpad * tn_eff * 4)                                # f32 accumulator
    vmem_limit = int(min(max(int(1.5 * est), 32 * 1024 * 1024), vmem_cap))

    outT = pl.pallas_call(
        _joinconv_gemm_kernel,
        out_shape=jax.ShapeDtypeStruct((Gpad, Npad), cdt),
        grid_spec=pltpu.PrefetchScalarGridSpec(
            num_scalar_prefetch=0,
            grid=(nn, nk),
            in_specs=[
                pl.BlockSpec((Gpad, tk_eff), lambda n, k: (0, k)),     # W^T
                pl.BlockSpec((tk_eff, tn_eff), lambda n, k: (k, n)),   # Xcol^T
                pl.BlockSpec((Gpad, 1), lambda n, k: (0, 0)),          # bias
            ],
            out_specs=pl.BlockSpec((Gpad, tn_eff), lambda n, k: (0, n)),
            scratch_shapes=[pltpu.VMEM((Gpad, tn_eff), jnp.float32)],
        ),
        compiler_params=pltpu.CompilerParams(
            dimension_semantics=("parallel", "arbitrary"),
            vmem_limit_bytes=vmem_limit),
    )(wT_p, xcolT_p, bias_p)

    # back to PyTorch NCHW convention
    Y = outT[:G, :Ndim].reshape(G, M, Sx, Sy).transpose(1, 0, 2, 3)
    return Y.astype(X.dtype)


if __name__ == "__main__":
    key = jax.random.PRNGKey(0)

    # small shapes consistent with the module
    Mb, F, G = 2, 4, 4          # batch, in_features, out_features
    Sx, Sy = 16, 16             # signal_dim
    Kx, Ky = 3, 3               # kernel_dim
    loc_x, loc_y = 0, 0         # kernel_loc

    conv_x = build_join_convolve_tensor(Sx, Kx, loc_x)
    conv_y = build_join_convolve_tensor(Sy, Ky, loc_y)

    k_w, k_b, k_x = jax.random.split(key, 3)
    fan_in = Ky * F * G
    weights = jax.random.normal(k_w, (Kx, Ky, F, G), jnp.float32) * np.sqrt(2.0 / fan_in)
    bias = 0.1 * jax.random.normal(k_b, (G, 1, 1), jnp.float32)  # nonzero: exercises bias path
    X = jax.random.normal(k_x, (Mb, F, Sx, Sy), jnp.float32)

    # pure-JAX reference (same contraction as the torch/opt_einsum forward)
    Y_ref = jnp.einsum('ixa,jyb,mfij,abfg->mgxy', conv_x, conv_y, X, weights,
                       precision=jax.lax.Precision.HIGHEST) + bias[None]

    fwd_f32 = jax.jit(functools.partial(join_conv2d_forward,
                                        compute_dtype=jnp.float32))
    fwd_bf16 = jax.jit(join_conv2d_forward)

    # f32-operand path: tight check of the kernel math
    Y32 = jax.block_until_ready(fwd_f32(X, conv_x, conv_y, weights, bias))
    assert Y32.shape == (Mb, G, Sx, Sy)
    np.testing.assert_allclose(np.asarray(Y32), np.asarray(Y_ref),
                               rtol=1e-4, atol=1e-4)

    # default bf16 path (bf16 operands/output, f32 accumulation): loosened tolerance
    Y = jax.block_until_ready(fwd_bf16(X, conv_x, conv_y, weights, bias))
    assert Y.shape == (Mb, G, Sx, Sy)
    np.testing.assert_allclose(np.asarray(Y), np.asarray(Y_ref),
                               rtol=3e-2, atol=3e-2)

    print("KERNEL_OK")
</pallas_src>

<mosaic_0001>
module attributes {stable_mosaic.version = 11 : i64} {
  func.func @_joinconv_gemm_kernel(%arg0: i32, %arg1: i32, %arg2: memref<16x40xf32, #tpu.memory_space<vmem>>, %arg3: memref<40x256xf32, #tpu.memory_space<vmem>>, %arg4: memref<16x1xf32, #tpu.memory_space<vmem>>, %arg5: memref<16x256xf32, #tpu.memory_space<vmem>>, %arg6: memref<16x256xf32, #tpu.memory_space<vmem>>) attributes {dimension_semantics = [#tpu.dimension_semantics<parallel>, #tpu.dimension_semantics<arbitrary>], iteration_bounds = array<i64: 2, 1>, scalar_prefetch = 0 : i64, scratch_operands = 1 : i64, tpu.core_type = #tpu.core_type<tc>, window_params = [{transform_indices = @transform_0, window_bounds = array<i64: 16, 40>}, {transform_indices = @transform_1, window_bounds = array<i64: 40, 256>}, {pipeline_mode = #tpu.pipeline_mode<synchronous>, transform_indices = @transform_2, window_bounds = array<i64: 16, 1>}, {transform_indices = @transform_3, window_bounds = array<i64: 16, 256>}]} {
    %c0_i32 = arith.constant 0 : i32
    %0 = arith.cmpi eq, %arg1, %c0_i32 : i32
    %1 = arith.extui %0 : i1 to i32
    %c0_i32_0 = arith.constant 0 : i32
    %2 = arith.cmpi ne, %1, %c0_i32_0 : i32
    scf.if %2 {
      %c0_10 = arith.constant 0 : index
      %c0_11 = arith.constant 0 : index
      %12 = vector.load %arg4[%c0_10, %c0_11] : memref<16x1xf32, #tpu.memory_space<vmem>>, vector<16x1xf32>
      %13 = vector.shape_cast %12 : vector<16x1xf32> to vector<16x1xf32>
      %14 = vector.broadcast %13 : vector<16x1xf32> to vector<16x256xf32>
      %c0_12 = arith.constant 0 : index
      %c0_13 = arith.constant 0 : index
      %15 = vector.load %arg6[%c0_12, %c0_13] : memref<16x256xf32, #tpu.memory_space<vmem>>, vector<16x256xf32>
      tpu.vector_store %arg6[%c0_12, %c0_13], %14 {strides = array<i32>} : memref<16x256xf32, #tpu.memory_space<vmem>>, vector<16x256xf32>,
    } else {
    }
    %c0 = arith.constant 0 : index
    %c0_1 = arith.constant 0 : index
    %3 = vector.load %arg6[%c0, %c0_1] : memref<16x256xf32, #tpu.memory_space<vmem>>, vector<16x256xf32>
    %c0_2 = arith.constant 0 : index
    %c0_3 = arith.constant 0 : index
    %4 = vector.load %arg2[%c0_2, %c0_3] : memref<16x40xf32, #tpu.memory_space<vmem>>, vector<16x40xf32>
    %c0_4 = arith.constant 0 : index
    %c0_5 = arith.constant 0 : index
    %5 = vector.load %arg3[%c0_4, %c0_5] : memref<40x256xf32, #tpu.memory_space<vmem>>, vector<40x256xf32>
    %cst = arith.constant dense<0.000000e+00> : vector<16x256xf32>
    %6 = tpu.matmul %4, %5, %cst {dimension_numbers = #tpu.dot_dimension_numbers<[1], [0], [0], [1], [0, 0, 1, 1], [], []>} : vector<16x40xf32>, vector<40x256xf32>, vector<16x256xf32> -> vector<16x256xf32>
    %7 = arith.addf %3, %6 : vector<16x256xf32>
    %c0_6 = arith.constant 0 : index
    %c0_7 = arith.constant 0 : index
    %8 = vector.load %arg6[%c0_6, %c0_7] : memref<16x256xf32, #tpu.memory_space<vmem>>, vector<16x256xf32>
    tpu.vector_store %arg6[%c0_6, %c0_7], %7 {strides = array<i32>} : memref<16x256xf32, #tpu.memory_space<vmem>>, vector<16x256xf32>,
    %c0_i32_8 = arith.constant 0 : i32
    %9 = arith.cmpi eq, %arg1, %c0_i32_8 : i32
    %10 = arith.extui %9 : i1 to i32
    %c0_i32_9 = arith.constant 0 : i32
    %11 = arith.cmpi ne, %10, %c0_i32_9 : i32
    scf.if %11 {
      %c0_10 = arith.constant 0 : index
      %c0_11 = arith.constant 0 : index
      %12 = vector.load %arg6[%c0_10, %c0_11] : memref<16x256xf32, #tpu.memory_space<vmem>>, vector<16x256xf32>
      %c0_12 = arith.constant 0 : index
      %c0_13 = arith.constant 0 : index
      %13 = vector.load %arg5[%c0_12, %c0_13] : memref<16x256xf32, #tpu.memory_space<vmem>>, vector<16x256xf32>
      tpu.vector_store %arg5[%c0_12, %c0_13], %12 {strides = array<i32>} : memref<16x256xf32, #tpu.memory_space<vmem>>, vector<16x256xf32>,
    } else {
    }
    return
  }
  func.func @transform_0(%arg0: i32, %arg1: i32) -> (i32, i32) {
    %c0_i32 = arith.constant 0 : i32
    %c0_i32_0 = arith.constant 0 : i32
    return %c0_i32, %arg1 : i32, i32
  }
  func.func @transform_1(%arg0: i32, %arg1: i32) -> (i32, i32) {
    %c0_i32 = arith.constant 0 : i32
    return %arg1, %arg0 : i32, i32
  }
  func.func @transform_2(%arg0: i32, %arg1: i32) -> (i32, i32) {
    %c0_i32 = arith.constant 0 : i32
    %c0_i32_0 = arith.constant 0 : i32
    %c0_i32_1 = arith.constant 0 : i32
    return %c0_i32, %c0_i32_0 : i32, i32
  }
  func.func @transform_3(%arg0: i32, %arg1: i32) -> (i32, i32) {
    %c0_i32 = arith.constant 0 : i32
    %c0_i32_0 = arith.constant 0 : i32
    return %c0_i32, %arg0 : i32, i32
  }
}

</mosaic_0001>

<bundles_post_ra>
// kernel: join_conv2d_forward.1
= control target key start
LH: loop header
LB: loop body
LE: loop exit
PB: predicated region body
PF: predicated region fallthrough
CT: control target
= control target key end

     0   :  { %s634_s12 = smov 0   ;;  %s636_s13 = smov 0   ;;  %s722_s0 = inlined_call_operand.vmem [shape: f32[16,40], index: 0, kind: input, shape index: {}]   ;;  %s723_s1 = inlined_call_operand.vmem [shape: f32[40,512], index: 1, kind: input, shape index: {}]   ;;  %s724_s2 = inlined_call_operand.vmem [shape: f32[16,1], index: 2, kind: input, shape index: {}]   ;;  %s725_s3 = inlined_call_operand.vmem [shape: f32[16,512], index: 3, kind: output, shape index: {}]  }
   0x1   :  { %s638_s14 = smov 0   ;;  %s640_s15 = smov 0  }
   0x2   :  { %s642_s16 = smov 0  }
   0x3 LB: > { %s25_s17 = sadd.s32 1, %s606_s15  ;;  %s495_s18 = sadd.s32 4294967295, %s610_s16   ;;  %s610_s16 = sphi %s642_s16, %s13_s16   ;;  %s606_s15 = sphi %s640_s15, %s730_s15   ;;  %s602_s14 = sphi %s638_s14, %s729_s14   ;;  %s598_s13 = sphi %s636_s13, %s728_s13   ;;  %s594_s12 = sphi %s634_s12, %s727_s12  }
   0x4   : > { %p27_p0 = scmp.ge.s32.totalorder %s25_s17, 2  ;;  %p67_p1 = scmp.ne.s32.totalorder %s598_s13, %s594_s12 }
   0x5   : > { %p68_p2 = scmp.eq.s32.totalorder %s610_s16, 0  ;;  %p118_p4 = scmp.eq.s32.totalorder %s495_s18, 1 }
   0x6   : > { %s732_s17 = smov (%p27_p0, %s25_s17), 0  ;;  %s60_s20 = sadd.s32 1, %s598_s13 }
   0x7   : > { %p69_p3 = por %p68_p2, %p67_p1  ;;  %s56_s19 = ssub.s32 %s606_s15, %s732_s17 }
   0x8   : > { %p58_p5 = scmp.eq.s32.totalorder %s56_s19, 0  ;;  %p669_p6 = por %p118_p4, %p67_p1 }
   0x9   : > { %p499_p7 = scmp.ge.s32.totalorder %s610_s16, 2 }
   0xa   : > { %s674_s22 = scalar_select %p58_p5, %s598_s13, %s60_s20  }
   0xb   : > { %150 = sbr.rel (%p499_p7) target bundleno = 27 (0x1b), region = 24 }
  0x12   : > { %153 = sbr.rel (!%p69_p3) target bundleno = 27 (0x1b), region = 28  ;;  %s155_s23 = sand.u32 (%p69_p3), 1, %s598_s13  }
  0x13   : > { %s511_s24 = sshll.u32 (%p69_p3), %s606_s15, 4  ;;  %s527_s25 = smul.u32 (%p69_p3), 80, %s155_s23 }
  0x14   : > { %s163_s28 = scalar_lea.vmem (%p69_p3), %s723_s1, %s511_s24 }
  0x15   : > { %v176_v0 = vld [vmem:[%s163_s28] sm:$0xff] (%p69_p3)  ;;  %v178_v1 = vld [vmem:[%s163_s28 + $0x8] sm:$0xff] (%p69_p3)  ;;  %s157_s29 = scalar_lea.vmem (%p69_p3), [#allocation3], %s527_s25 }
  0x16   : > { %v180_v2 = vld [vmem:[%s163_s28 + $0x20] sm:$0xff] (%p69_p3)  ;;  %v182_v3 = vld [vmem:[%s163_s28 + $0x28] sm:$0xff] (%p69_p3)  ;;  %177 = vst [vmem:[%s157_s29] sm:$0xff] (%p69_p3), %v176_v0  ;;  %179 = vst [vmem:[%s157_s29 + $0x8] sm:$0xff] (%p69_p3), %v178_v1 }
  0x17   : > { %v184_v4 = vld [vmem:[%s163_s28 + $0x40] sm:$0xff] (%p69_p3)  ;;  %v186_v5 = vld [vmem:[%s163_s28 + $0x48] sm:$0xff] (%p69_p3)  ;;  %181 = vst [vmem:[%s157_s29 + $0x10] sm:$0xff] (%p69_p3), %v180_v2  ;;  %183 = vst [vmem:[%s157_s29 + $0x18] sm:$0xff] (%p69_p3), %v182_v3 }
  0x18   : > { %185 = vst [vmem:[%s157_s29 + $0x20] sm:$0xff] (%p69_p3), %v184_v4  ;;  %187 = vst [vmem:[%s157_s29 + $0x28] sm:$0xff] (%p69_p3), %v186_v5  ;;  %v188_v6 = vld [vmem:[%s163_s28 + $0x60] sm:$0xff] (%p69_p3)  ;;  %v190_v7 = vld [vmem:[%s163_s28 + $0x68] sm:$0xff] (%p69_p3) }
  0x19   : > { %v192_v8 = vld [vmem:[%s163_s28 + $0x80] sm:$0xff]  ;;  %189 = vst [vmem:[%s157_s29 + $0x30] sm:$0xff] %v188_v6  ;;  %191 = vst [vmem:[%s157_s29 + $0x38] sm:$0xff] %v190_v7  ;;  %v194_v9 = vld [vmem:[%s163_s28 + $0x88] sm:$0xff] }
  0x1a   : > { %193 = vst [vmem:[%s157_s29 + $0x40] sm:$0xff] %v192_v8  ;;  %195 = vst [vmem:[%s157_s29 + $0x48] sm:$0xff] %v194_v9 }
  0x1b PF: > { %p502_p8 = scmp.ge.s32.totalorder %s610_s16, 1  ;;  %p200_p9 = scmp.lt.s32.totalorder %s610_s16, 3 }
  0x1d   : > { %p201_p10 = pnand %p502_p8, %p200_p9 }
  0x1e   : > { %s207_s30 = sand.u32 (!%p201_p10), 1, %s594_s12   ;;  %v612_v10 = vmov (!%p201_p10), 0.0   ;;  %v244_v11 = vld [vmem:[%s724_s2] sm:$0xff] (!%p201_p10)  ;;  %v613_v12 = vmov (!%p201_p10), 0   ;;  %v245_v24 = vld [vmem:[%s724_s2 + $0x8] sm:$0xff] (!%p201_p10)  ;;  %vm276_vm0 = vcmask (!%p201_p10), 326656  }
  0x1f   : > { %204 = sbr.rel (%p201_p10) target bundleno = 272 (0x110), region = 51  ;;  %347 = vmatprep.mubr.f32.mxu0 (!%p201_p10), %v612_v10  ;;  %353 = vmatprep.mubr.f32.mxu1 (!%p201_p10), %v612_v10  ;;  %v264_v28 = vld [vmem:[%s722_s0] sm:$0xff] (!%p201_p10)  ;;  %v265_v29 = vld [vmem:[%s722_s0 + $0x8] sm:$0xff] (!%p201_p10)  ;;  %s503_s20 = sshll.u32 (!%p201_p10), %s207_s30, 5 }
  0x20   : > { %s528_s4 = smul.u32 (!%p201_p10), 80, %s207_s30  ;;  %571 = vset.pattern.permute.xlu0 (!%p201_p10), %v613_v12  ;;  %s232_s23 = scalar_lea.vmem (!%p201_p10), [#allocation4], %s503_s20 }
  0x21   : > { %248 = vperm.xlu0 (!%p201_p10), %571, %v244_v11  }
  0x22   : > { %s209_s7 = scalar_lea.vmem (!%p201_p10), [#allocation3], %s528_s4 }
  0x23   : > { %v267_v13 = vld [vmem:[%s209_s7 + $0x8] sm:$0xff] (!%p201_p10)  ;;  %v269_v14 = vld [vmem:[%s209_s7 + $0x18] sm:$0xff] (!%p201_p10)  ;;  %v266_v15 = vld [vmem:[%s209_s7] sm:$0xff] (!%p201_p10) }
  0x24   : > { %v513_v16 = vpack.c.bf16 (!%p201_p10), %v269_v14, %v267_v13  ;;  %v268_v17 = vld [vmem:[%s209_s7 + $0x10] sm:$0xff] (!%p201_p10)  ;;  %v271_v18 = vld [vmem:[%s209_s7 + $0x28] sm:$0xff] (!%p201_p10)  ;;  %v273_v19 = vld [vmem:[%s209_s7 + $0x38] sm:$0xff] (!%p201_p10) }
  0x25   : > { %v515_v20 = vpack.c.bf16 (!%p201_p10), %v268_v17, %v266_v15  ;;  %v517_v21 = vpack.c.bf16 (!%p201_p10), %v273_v19, %v271_v18  ;;  %v270_v22 = vld [vmem:[%s209_s7 + $0x20] sm:$0xff] (!%p201_p10)  ;;  %v272_v23 = vld [vmem:[%s209_s7 + $0x30] sm:$0xff] (!%p201_p10)  ;;  %v275_v26 = vld [vmem:[%s209_s7 + $0x48] sm:$0xff] (!%p201_p10)  ;;  %253 = vperm.xlu0 (!%p201_p10), %571, %v245_v24  }
  0x26   : > { %514 = vmatprep.subr.bf16.mxu0 %v513_v16  ;;  %521 = vmatprep.subr.bf16.mxu1 %v513_v16  ;;  %v519_v25 = vpack.c.bf16 %v272_v23, %v270_v22  ;;  %v274_v27 = vld [vmem:[%s209_s7 + $0x40] sm:$0xff]  ;;  %s512_s12 = sshll.u32 (%p669_p6), %s602_s14, 4 }
  0x27   : > { %516 = vmatpush1.bf16.msra.mxu0 %v515_v20  ;;  %524 = vmatpush1.bf16.msra.mxu1 %v515_v20  ;;  %s388_s26 = scalar_lea.vmem (%p669_p6), %s725_s3, %s512_s12 }
  0x28   : > { %518 = vmatprep.subr.bf16.mxu0 %v517_v21  ;;  %522 = vmatprep.subr.bf16.mxu1 %v517_v21 }
  0x2b   : > { %520 = vmatpush1.bf16.msra.mxu0 %v519_v25  ;;  %525 = vmatpush1.bf16.msra.mxu1 %v519_v25 }
  0x2c   : > { %291 = vmatprep.subr.mxu0 %v275_v26  ;;  %523 = vmatprep.subr.mxu1 %v275_v26 }
  0x2f   : > { %292 = vmatpush1.msra.mxu0 %v274_v27  ;;  %526 = vmatpush1.msra.mxu1 %v274_v27 }
  0x30   : > { %504 = vmatmul.mubr.msk.f32.vlgmr.msra.gmra.mrb[0].mxu0 %vm276_vm0, %v264_v28  ;;  %505 = vmatmul.mubr.msk.f32.vlgmr.msra.gmra.mrb[0].mxu1 %vm276_vm0, %v265_v29 }
  0xa0   : > { %v249_v30 = vpop.permute.xlu0 %248 }
  0xa4   : > { %v254_v31 = vpop.permute.xlu0 %253 }
 0x101   : > { %385 = sbr.rel (!%p669_p6) target bundleno = 272 (0x110), region = 67 }
 0x103   : > { %v349_v32 = vpop.f32.mrb[0].mxu0  ;;  %v355_v33 = vpop.f32.mrb[0].mxu1 }
 0x104   : > { %v360_v34 = vadd.f32 %v349_v32, %v249_v30  ;;  %v362_v35 = vadd.f32 %v355_v33, %v254_v31  ;;  %v351_v36 = vpop.f32.mrb[1].mxu0  ;;  %v357_v37 = vpop.f32.mrb[1].mxu1 }
 0x105   : > { %v361_v38 = vadd.f32 %v351_v36, %v249_v30  ;;  %v363_v39 = vadd.f32 %v357_v37, %v254_v31 }
 0x106   : > { %375 = vst [vmem:[%s232_s23] sm:$0xff] %v360_v34  ;;  %377 = vst [vmem:[%s232_s23 + $0x10] sm:$0xff] %v362_v35 }
 0x107   : > { %376 = vst [vmem:[%s232_s23 + $0x8] sm:$0xff] %v361_v38  ;;  %378 = vst [vmem:[%s232_s23 + $0x18] sm:$0xff] %v363_v39 }
 0x10d   : > { %v401_v40 = vld [vmem:[%s232_s23] sm:$0xff]  ;;  %v405_v42 = vld [vmem:[%s232_s23 + $0x10] sm:$0xff] }
 0x10e   : > { %v403_v41 = vld [vmem:[%s232_s23 + $0x8] sm:$0xff]  ;;  %v407_v43 = vld [vmem:[%s232_s23 + $0x18] sm:$0xff]  ;;  %402 = vst [vmem:[%s388_s26] sm:$0xff] %v401_v40  ;;  %406 = vst [vmem:[%s388_s26 + $0x20] sm:$0xff] %v405_v42 }
 0x10f   : > { %404 = vst [vmem:[%s388_s26 + $0x8] sm:$0xff] %v403_v41  ;;  %408 = vst [vmem:[%s388_s26 + $0x28] sm:$0xff] %v407_v43 }
 0x110 PF: > { %s13_s16 = sadd.s32 1, %s610_s16   ;;  %s727_s12 = smov %s598_s13 }
 0x111   : > { %p10_p11 = scmp.ge.s32.totalorder %s13_s16, 4   ;;  %s728_s13 = smov %s674_s22 }
 0x112   : > { %s729_s14 = smov %s606_s15  ;;  %s730_s15 = smov %s732_s17 }
 0x113   :  { %12 = sbr.rel (!%p10_p11) target bundleno = 3 (0x3), region = 124 }

</bundles_post_ra>
